<compile_context>
chip_gen: v5e
topology: v5e:2x2
jax: 0.10.0
libtpu: 0.0.40
codegen_flags: <defaults>
</compile_context>

<pallas_src>
import jax
import jax.numpy as jnp
from jax.experimental import pallas as pl
from jax.experimental.pallas import tpu as pltpu


# ----------------------------- model sizes ---------------------------------
IMAGE_SIZE = 784              # 1*28*28, implied by x.view(-1, 784)
IMAGE_PAD = 896               # 7*128 -> lane-dense recon output block
HIDDEN_1 = 128
HIDDEN_2 = 64
LATENT = 16
BATCH = 8

# rows of the packed bias block
_B1_ROW, _B2_ROW, _BZ_ROW, _B4_ROW, _B5_ROW, _B6_ROW = 0, 1, 2, 3, 4, 5


# ------------------------------ the kernel ---------------------------------
def vae_forward_kernel(
    x_ref, eps_ref,
    w1_ref, w2_ref, wz_ref, w4_ref, w5_ref, w6_ref,
    bias_ref,
    recon_ref, mulogvar_ref,
):
    f32 = jnp.float32
    bf16 = jnp.bfloat16

    # biases live in a single packed (8, 896) f32 block; static lane slices.
    bias = bias_ref[...]
    b1 = bias[_B1_ROW:_B1_ROW + 1, :HIDDEN_1]
    b2 = bias[_B2_ROW:_B2_ROW + 1, :HIDDEN_2]
    bz = bias[_BZ_ROW:_BZ_ROW + 1, :2 * LATENT]
    b4 = bias[_B4_ROW:_B4_ROW + 1, :HIDDEN_2]
    b5 = bias[_B5_ROW:_B5_ROW + 1, :HIDDEN_1]
    b6 = bias[_B6_ROW:_B6_ROW + 1, :IMAGE_PAD]

    w1, w2, wz = w1_ref[...], w2_ref[...], wz_ref[...]
    w4, w5, w6 = w4_ref[...], w5_ref[...], w6_ref[...]

    def chain(x_f32, eps):
        # ---- encode (bf16 MXU inputs, f32 accumulation, f32 nonlinearities).
        # x is cast f32->bf16 here (cheap VPU op hidden under the MXU) instead
        # of in the wrapper, saving a standalone convert HLO + HBM round trip.
        h1 = jnp.tanh(
            jnp.dot(x_f32.astype(bf16), w1, preferred_element_type=f32) + b1)
        h2 = jnp.maximum(
            jnp.dot(h1.astype(bf16), w2, preferred_element_type=f32) + b2, 0.0)
        # fused fc31/fc32: one (64, 32) projection; mu = [:, :16], logvar = [:, 16:]
        ml = jnp.dot(h2.astype(bf16), wz, preferred_element_type=f32) + bz
        mu, logvar = ml[:, :LATENT], ml[:, LATENT:]

        # ---- reparameterize (f32 EUP math) ----
        z = mu + jnp.exp(0.5 * logvar) * eps

        # ---- decode ----
        h3 = jnp.tanh(
            jnp.dot(z.astype(bf16), w4, preferred_element_type=f32) + b4)
        h4 = jnp.maximum(
            jnp.dot(h3.astype(bf16), w5, preferred_element_type=f32) + b5, 0.0)
        logits = jnp.dot(h4.astype(bf16), w6, preferred_element_type=f32) + b6

        # sigmoid = 1 / (1 + exp(-x)): exp and approx reciprocal both live in
        # the EUP slot, no VALU divide.  Result stored as bf16 (halves the
        # dominant HBM write stream; values in [0,1] survive bf16 easily).
        recon = pl.reciprocal(1.0 + jnp.exp(-logits), approx=True)
        return recon.astype(bf16), ml

    tb = x_ref.shape[0]
    # For large tiles, run two independent row halves inside one basic block:
    # the second dependency chain lets the scheduler fill the MXU drain /
    # nonlinearity bubbles at layer boundaries (v5e/v6e MRF).
    n_split = 2 if (tb >= 128 and tb % 32 == 0) else 1
    rows = tb // n_split
    for s in range(n_split):
        lo, hi = s * rows, (s + 1) * rows
        recon_s, ml_s = chain(x_ref[lo:hi, :], eps_ref[lo:hi, :])
        recon_ref[lo:hi, :] = recon_s            # bf16, unmasked full-vreg stores
        mulogvar_ref[lo:hi, :] = ml_s            # f32, packed mu||logvar


# -------------------------- one-time param packing ---------------------------
def prepare_params(params):
    """Hoisted off the hot path: call once, reuse the result for every forward.

    Fuses fc31/fc32, pads fc6 to a lane-dense 896-wide output, packs all seven
    bias vectors into one (8, 896) f32 block, and casts weights to bf16."""
    f32, bf16 = jnp.float32, jnp.bfloat16

    wz = jnp.concatenate([params["w31"], params["w32"]], axis=1)   # (64, 32)
    bz = jnp.concatenate([params["b31"], params["b32"]], axis=1)   # (1, 32)

    w6p = jnp.pad(params["w6"], ((0, 0), (0, IMAGE_PAD - IMAGE_SIZE)))
    b6p = jnp.pad(params["b6"], ((0, 0), (0, IMAGE_PAD - IMAGE_SIZE)))

    def _row(b):
        return jnp.pad(b, ((0, 0), (0, IMAGE_PAD - b.shape[1])))

    bias_pack = jnp.concatenate(
        [_row(params["b1"]), _row(params["b2"]), _row(bz),
         _row(params["b4"]), _row(params["b5"]), b6p,
         jnp.zeros((2, IMAGE_PAD), f32)],
        axis=0,
    ).astype(f32)                                                   # (8, 896)

    # TODO(synk): optional int8 weight quantization for v5e/v6e small-batch
    # (weight-DMA-bound) regime; kept bf16 here to preserve accuracy.
    weights = tuple(
        w.astype(bf16)
        for w in (params["w1"], params["w2"], wz, params["w4"], params["w5"], w6p)
    )
    return {"weights": weights, "bias_pack": bias_pack}


# ------------------------------ tile picking --------------------------------
def _pick_tile_b(B):
    """Largest 16-aligned divisor of B that is <= 1024 and gives >= 2 grid
    steps when B >= 32 (so v7x's two TensorCores both get work).  Falls back
    to a single full-batch tile when no aligned divisor exists."""
    if B < 32:
        return B
    target = min(1024, B // 2)
    t = (target // 16) * 16
    while t >= 16:
        if B % t == 0:
            return t
        t -= 16
    return B


# ------------------------------ the wrapper --------------------------------
def vae_forward(x_flat, eps, packed, *, tile_b=None):
    """x_flat: (B, 784) f32, eps: (B, 16) f32, packed: prepare_params() output."""
    B, D = x_flat.shape
    assert D == IMAGE_SIZE
    if tile_b is None:
        tile_b = _pick_tile_b(B)
    assert B % tile_b == 0, "tile_b must divide B"
    assert tile_b == B or tile_b % 8 == 0, "partial tiles must be sublane-aligned"

    f32, bf16 = jnp.float32, jnp.bfloat16
    weights = packed["weights"]
    bias_pack = packed["bias_pack"]

    # Weight/bias blocks revisit the same index every grid step -> single
    # buffer (the DMA is only issued on the first step anyway).
    def resident_spec(arr):
        return pl.BlockSpec(arr.shape, lambda i: (0, 0),
                            pipeline_mode=pl.Buffered(1))

    in_specs = (
        [pl.BlockSpec((tile_b, IMAGE_SIZE), lambda i: (i, 0)),      # x (f32)
         pl.BlockSpec((tile_b, LATENT), lambda i: (i, 0))]          # eps (f32)
        + [resident_spec(w) for w in weights]
        + [resident_spec(bias_pack)]
    )
    out_specs = [
        pl.BlockSpec((tile_b, IMAGE_PAD), lambda i: (i, 0)),        # recon (bf16, padded)
        pl.BlockSpec((tile_b, 2 * LATENT), lambda i: (i, 0)),       # mu||logvar (f32)
    ]
    out_shape = (
        jax.ShapeDtypeStruct((B, IMAGE_PAD), bf16),
        jax.ShapeDtypeStruct((B, 2 * LATENT), f32),
    )

    # --- advisory cost estimate (params counted once: constant index_map) ---
    flops = 2 * B * (IMAGE_SIZE * HIDDEN_1 + HIDDEN_1 * HIDDEN_2
                     + HIDDEN_2 * 2 * LATENT + LATENT * HIDDEN_2
                     + HIDDEN_2 * HIDDEN_1 + HIDDEN_1 * IMAGE_PAD)
    transcendentals = B * (HIDDEN_1 + LATENT + HIDDEN_2 + 2 * IMAGE_PAD)
    param_bytes = (sum(int(w.size) * w.dtype.itemsize for w in weights)
                   + int(bias_pack.size) * 4)
    act_bytes = B * (IMAGE_SIZE * 4 + LATENT * 4          # inputs (f32)
                     + IMAGE_PAD * 2 + 2 * LATENT * 4)    # outputs (bf16 / f32)
    cost = pl.CostEstimate(
        flops=int(flops),
        transcendentals=int(transcendentals),
        bytes_accessed=int(param_bytes + act_bytes),
    )

    # --- VMEM budget: double-buffered activation blocks + resident weights ---
    act_block_bytes = tile_b * (IMAGE_SIZE * 4 + LATENT * 4
                                + IMAGE_PAD * 2 + 2 * LATENT * 4)
    vmem_need = 2 * act_block_bytes + param_bytes + (12 << 20)   # + scratch headroom
    # cap below v7x's 64 MiB physical VMEM to leave compiler scratch headroom
    vmem_limit = int(min(max(vmem_need, 32 << 20), 48 << 20))

    recon_pad, mulogvar = pl.pallas_call(
        vae_forward_kernel,
        out_shape=out_shape,
        grid=(B // tile_b,),
        in_specs=in_specs,
        out_specs=out_specs,
        compiler_params=pltpu.CompilerParams(
            dimension_semantics=("parallel",),   # shards batch tiles across TCs (v7x)
            vmem_limit_bytes=vmem_limit,
        ),
        cost_estimate=cost,
    )(x_flat.astype(f32), eps.astype(f32), *weights, bias_pack)

    # slice off pad columns and upcast for callers expecting f32 (fused slice+cast)
    recon = recon_pad[:, :IMAGE_SIZE].astype(f32)
    mu = mulogvar[:, :LATENT]
    logvar = mulogvar[:, LATENT:]
    return recon, mu, logvar


# -------------------------- deterministic params ---------------------------
def init_linear(key, fan_in, fan_out):
    """PyTorch-style uniform(-1/sqrt(fan_in), 1/sqrt(fan_in)) init.
    Weight stored as (in_features, out_features); bias as (1, out_features)."""
    kw, kb = jax.random.split(key)
    bound = 1.0 / jnp.sqrt(jnp.float32(fan_in))
    w = jax.random.uniform(kw, (fan_in, fan_out), jnp.float32, -bound, bound)
    b = jax.random.uniform(kb, (1, fan_out), jnp.float32, -bound, bound)
    return w, b


def init_vae_params(key):
    keys = jax.random.split(key, 7)
    p = {}
    p["w1"], p["b1"] = init_linear(keys[0], IMAGE_SIZE, HIDDEN_1)
    p["w2"], p["b2"] = init_linear(keys[1], HIDDEN_1, HIDDEN_2)
    p["w31"], p["b31"] = init_linear(keys[2], HIDDEN_2, LATENT)
    p["w32"], p["b32"] = init_linear(keys[3], HIDDEN_2, LATENT)
    p["w4"], p["b4"] = init_linear(keys[4], LATENT, HIDDEN_2)
    p["w5"], p["b5"] = init_linear(keys[5], HIDDEN_2, HIDDEN_1)
    p["w6"], p["b6"] = init_linear(keys[6], HIDDEN_1, IMAGE_SIZE)
    return p


# ---------------------------- pure-JAX reference ---------------------------
def vae_forward_ref(x_flat, eps, p, compute_dtype=jnp.float32):
    """Reference. compute_dtype=bf16 mimics the kernel's MXU input precision."""
    def lin(a, w, b):
        return jnp.dot(a.astype(compute_dtype), w.astype(compute_dtype),
                       preferred_element_type=jnp.float32) + b
    h1 = jnp.tanh(lin(x_flat, p["w1"], p["b1"]))
    h2 = jax.nn.relu(lin(h1, p["w2"], p["b2"]))
    mu = lin(h2, p["w31"], p["b31"])
    logvar = lin(h2, p["w32"], p["b32"])
    z = mu + jnp.exp(0.5 * logvar) * eps
    h3 = jnp.tanh(lin(z, p["w4"], p["b4"]))
    h4 = jax.nn.relu(lin(h3, p["w5"], p["b5"]))
    recon = jax.nn.sigmoid(lin(h4, p["w6"], p["b6"]))
    return recon, mu, logvar


# ---------------------------------- main ------------------------------------
if __name__ == "__main__":
    key = jax.random.PRNGKey(0)
    k_params, k_x, k_eps = jax.random.split(key, 3)

    params = init_vae_params(k_params)
    packed = prepare_params(params)          # one-time packing, off the hot path

    # "MNIST-like" input: (B, 1, 28, 28), flattened exactly like x.view(-1, 784).
    x_img = jax.random.uniform(k_x, (BATCH, 1, 28, 28), jnp.float32)
    x_flat = x_img.reshape(-1, IMAGE_SIZE)

    # Standard-normal noise for reparameterize (torch.randn_like equivalent).
    eps = jax.random.normal(k_eps, (BATCH, LATENT), jnp.float32)

    recon, mu, logvar = vae_forward(x_flat, eps, packed)
    jax.block_until_ready((recon, mu, logvar))

    assert recon.shape == (BATCH, IMAGE_SIZE)
    assert mu.shape == (BATCH, LATENT) and logvar.shape == (BATCH, LATENT)

    # Check vs. a bf16-compute reference (same MXU precision as the kernel;
    # recon is additionally bf16-quantized + approx-reciprocal in the kernel).
    recon_b, mu_b, logvar_b = vae_forward_ref(x_flat, eps, params,
                                              compute_dtype=jnp.bfloat16)
    assert jnp.allclose(recon, recon_b, atol=2e-2, rtol=2e-2)
    assert jnp.allclose(mu, mu_b, atol=1e-2, rtol=1e-2)
    assert jnp.allclose(logvar, logvar_b, atol=1e-2, rtol=1e-2)

    # Loose check vs. the full-f32 reference (bf16 weight quantization error).
    recon_r, mu_r, logvar_r = vae_forward_ref(x_flat, eps, params)
    assert jnp.allclose(recon, recon_r, atol=5e-2, rtol=5e-2)
    assert jnp.allclose(mu, mu_r, atol=5e-2, rtol=5e-2)
    assert jnp.allclose(logvar, logvar_r, atol=5e-2, rtol=5e-2)

    print("KERNEL_OK")
</pallas_src>

<mosaic_0001>
module attributes {stable_mosaic.version = 11 : i64} {
  func.func @vae_forward_kernel(%arg0: i32, %arg1: memref<8x784xf32, #tpu.memory_space<vmem>>, %arg2: memref<8x16xf32, #tpu.memory_space<vmem>>, %arg3: memref<784x128xbf16, #tpu.memory_space<vmem>>, %arg4: memref<128x64xbf16, #tpu.memory_space<vmem>>, %arg5: memref<64x32xbf16, #tpu.memory_space<vmem>>, %arg6: memref<16x64xbf16, #tpu.memory_space<vmem>>, %arg7: memref<64x128xbf16, #tpu.memory_space<vmem>>, %arg8: memref<128x896xbf16, #tpu.memory_space<vmem>>, %arg9: memref<8x896xf32, #tpu.memory_space<vmem>>, %arg10: memref<8x896xbf16, #tpu.memory_space<vmem>>, %arg11: memref<8x32xf32, #tpu.memory_space<vmem>>) attributes {dimension_semantics = [#tpu.dimension_semantics<parallel>], iteration_bounds = array<i64: 1>, scalar_prefetch = 0 : i64, scratch_operands = 0 : i64, tpu.core_type = #tpu.core_type<tc>, window_params = [{transform_indices = @transform_0, window_bounds = array<i64: 8, 784>}, {transform_indices = @transform_1, window_bounds = array<i64: 8, 16>}, {pipeline_mode = #tpu.pipeline_mode<synchronous>, transform_indices = @transform_2, window_bounds = array<i64: 784, 128>}, {pipeline_mode = #tpu.pipeline_mode<synchronous>, transform_indices = @transform_3, window_bounds = array<i64: 128, 64>}, {pipeline_mode = #tpu.pipeline_mode<synchronous>, transform_indices = @transform_4, window_bounds = array<i64: 64, 32>}, {pipeline_mode = #tpu.pipeline_mode<synchronous>, transform_indices = @transform_5, window_bounds = array<i64: 16, 64>}, {pipeline_mode = #tpu.pipeline_mode<synchronous>, transform_indices = @transform_6, window_bounds = array<i64: 64, 128>}, {pipeline_mode = #tpu.pipeline_mode<synchronous>, transform_indices = @transform_7, window_bounds = array<i64: 128, 896>}, {pipeline_mode = #tpu.pipeline_mode<synchronous>, transform_indices = @transform_8, window_bounds = array<i64: 8, 896>}, {transform_indices = @transform_9, window_bounds = array<i64: 8, 896>}, {transform_indices = @transform_10, window_bounds = array<i64: 8, 32>}]} {
    %c0 = arith.constant 0 : index
    %c0_0 = arith.constant 0 : index
    %0 = vector.load %arg9[%c0, %c0_0] : memref<8x896xf32, #tpu.memory_space<vmem>>, vector<8x896xf32>
    %1 = vector.extract_strided_slice %0 {offsets = [0, 0], sizes = [1, 128], strides = [1, 1]} : vector<8x896xf32> to vector<1x128xf32>
    %2 = vector.extract_strided_slice %0 {offsets = [1, 0], sizes = [1, 64], strides = [1, 1]} : vector<8x896xf32> to vector<1x64xf32>
    %3 = vector.extract_strided_slice %0 {offsets = [2, 0], sizes = [1, 32], strides = [1, 1]} : vector<8x896xf32> to vector<1x32xf32>
    %4 = vector.extract_strided_slice %0 {offsets = [3, 0], sizes = [1, 64], strides = [1, 1]} : vector<8x896xf32> to vector<1x64xf32>
    %5 = vector.extract_strided_slice %0 {offsets = [4, 0], sizes = [1, 128], strides = [1, 1]} : vector<8x896xf32> to vector<1x128xf32>
    %6 = vector.extract_strided_slice %0 {offsets = [5, 0], sizes = [1, 896], strides = [1, 1]} : vector<8x896xf32> to vector<1x896xf32>
    %c0_1 = arith.constant 0 : index
    %c0_2 = arith.constant 0 : index
    %7 = vector.load %arg3[%c0_1, %c0_2] : memref<784x128xbf16, #tpu.memory_space<vmem>>, vector<784x128xbf16>
    %c0_3 = arith.constant 0 : index
    %c0_4 = arith.constant 0 : index
    %8 = vector.load %arg4[%c0_3, %c0_4] : memref<128x64xbf16, #tpu.memory_space<vmem>>, vector<128x64xbf16>
    %c0_5 = arith.constant 0 : index
    %c0_6 = arith.constant 0 : index
    %9 = vector.load %arg5[%c0_5, %c0_6] : memref<64x32xbf16, #tpu.memory_space<vmem>>, vector<64x32xbf16>
    %c0_7 = arith.constant 0 : index
    %c0_8 = arith.constant 0 : index
    %10 = vector.load %arg6[%c0_7, %c0_8] : memref<16x64xbf16, #tpu.memory_space<vmem>>, vector<16x64xbf16>
    %c0_9 = arith.constant 0 : index
    %c0_10 = arith.constant 0 : index
    %11 = vector.load %arg7[%c0_9, %c0_10] : memref<64x128xbf16, #tpu.memory_space<vmem>>, vector<64x128xbf16>
    %c0_11 = arith.constant 0 : index
    %c0_12 = arith.constant 0 : index
    %12 = vector.load %arg8[%c0_11, %c0_12] : memref<128x896xbf16, #tpu.memory_space<vmem>>, vector<128x896xbf16>
    %c0_13 = arith.constant 0 : index
    %c0_14 = arith.constant 0 : index
    %13 = vector.load %arg1[%c0_13, %c0_14] : memref<8x784xf32, #tpu.memory_space<vmem>>, vector<8x784xf32>
    %c0_15 = arith.constant 0 : index
    %c0_16 = arith.constant 0 : index
    %14 = vector.load %arg2[%c0_15, %c0_16] : memref<8x16xf32, #tpu.memory_space<vmem>>, vector<8x16xf32>
    %15 = arith.truncf %13 : vector<8x784xf32> to vector<8x784xbf16>
    %cst = arith.constant dense<0.000000e+00> : vector<8x128xf32>
    %16 = tpu.matmul %15, %7, %cst {dimension_numbers = #tpu.dot_dimension_numbers<[1], [0], [0], [1], [0, 0, 1, 1], [], []>} : vector<8x784xbf16>, vector<784x128xbf16>, vector<8x128xf32> -> vector<8x128xf32>
    %17 = vector.broadcast %1 : vector<1x128xf32> to vector<8x128xf32>
    %18 = arith.addf %16, %17 : vector<8x128xf32>
    %19 = math.tanh %18 : vector<8x128xf32>
    %20 = arith.truncf %19 : vector<8x128xf32> to vector<8x128xbf16>
    %cst_17 = arith.constant dense<0.000000e+00> : vector<8x64xf32>
    %21 = tpu.matmul %20, %8, %cst_17 {dimension_numbers = #tpu.dot_dimension_numbers<[1], [0], [0], [1], [0, 0, 1, 1], [], []>} : vector<8x128xbf16>, vector<128x64xbf16>, vector<8x64xf32> -> vector<8x64xf32>
    %22 = vector.broadcast %2 : vector<1x64xf32> to vector<8x64xf32>
    %23 = arith.addf %21, %22 : vector<8x64xf32>
    %cst_18 = arith.constant 0.000000e+00 : f32
    %24 = vector.broadcast %cst_18 : f32 to vector<8x64xf32>
    %25 = arith.maximumf %23, %24 : vector<8x64xf32>
    %26 = arith.truncf %25 : vector<8x64xf32> to vector<8x64xbf16>
    %cst_19 = arith.constant dense<0.000000e+00> : vector<8x32xf32>
    %27 = tpu.matmul %26, %9, %cst_19 {dimension_numbers = #tpu.dot_dimension_numbers<[1], [0], [0], [1], [0, 0, 1, 1], [], []>} : vector<8x64xbf16>, vector<64x32xbf16>, vector<8x32xf32> -> vector<8x32xf32>
    %28 = vector.broadcast %3 : vector<1x32xf32> to vector<8x32xf32>
    %29 = arith.addf %27, %28 : vector<8x32xf32>
    %30 = vector.extract_strided_slice %29 {offsets = [0, 0], sizes = [8, 16], strides = [1, 1]} : vector<8x32xf32> to vector<8x16xf32>
    %31 = vector.extract_strided_slice %29 {offsets = [0, 16], sizes = [8, 16], strides = [1, 1]} : vector<8x32xf32> to vector<8x16xf32>
    %cst_20 = arith.constant 5.000000e-01 : f32
    %32 = vector.broadcast %cst_20 : f32 to vector<8x16xf32>
    %33 = arith.mulf %32, %31 : vector<8x16xf32>
    %34 = math.exp %33 : vector<8x16xf32>
    %35 = arith.mulf %34, %14 : vector<8x16xf32>
    %36 = arith.addf %30, %35 : vector<8x16xf32>
    %37 = arith.truncf %36 : vector<8x16xf32> to vector<8x16xbf16>
    %cst_21 = arith.constant dense<0.000000e+00> : vector<8x64xf32>
    %38 = tpu.matmul %37, %10, %cst_21 {dimension_numbers = #tpu.dot_dimension_numbers<[1], [0], [0], [1], [0, 0, 1, 1], [], []>} : vector<8x16xbf16>, vector<16x64xbf16>, vector<8x64xf32> -> vector<8x64xf32>
    %39 = vector.broadcast %4 : vector<1x64xf32> to vector<8x64xf32>
    %40 = arith.addf %38, %39 : vector<8x64xf32>
    %41 = math.tanh %40 : vector<8x64xf32>
    %42 = arith.truncf %41 : vector<8x64xf32> to vector<8x64xbf16>
    %cst_22 = arith.constant dense<0.000000e+00> : vector<8x128xf32>
    %43 = tpu.matmul %42, %11, %cst_22 {dimension_numbers = #tpu.dot_dimension_numbers<[1], [0], [0], [1], [0, 0, 1, 1], [], []>} : vector<8x64xbf16>, vector<64x128xbf16>, vector<8x128xf32> -> vector<8x128xf32>
    %44 = vector.broadcast %5 : vector<1x128xf32> to vector<8x128xf32>
    %45 = arith.addf %43, %44 : vector<8x128xf32>
    %cst_23 = arith.constant 0.000000e+00 : f32
    %46 = vector.broadcast %cst_23 : f32 to vector<8x128xf32>
    %47 = arith.maximumf %45, %46 : vector<8x128xf32>
    %48 = arith.truncf %47 : vector<8x128xf32> to vector<8x128xbf16>
    %cst_24 = arith.constant dense<0.000000e+00> : vector<8x896xf32>
    %49 = tpu.matmul %48, %12, %cst_24 {dimension_numbers = #tpu.dot_dimension_numbers<[1], [0], [0], [1], [0, 0, 1, 1], [], []>} : vector<8x128xbf16>, vector<128x896xbf16>, vector<8x896xf32> -> vector<8x896xf32>
    %50 = vector.broadcast %6 : vector<1x896xf32> to vector<8x896xf32>
    %51 = arith.addf %49, %50 : vector<8x896xf32>
    %cst_25 = arith.constant 0.000000e+00 : f32
    %52 = vector.broadcast %cst_25 : f32 to vector<8x896xf32>
    %53 = arith.subf %52, %51 : vector<8x896xf32>
    %54 = math.exp %53 : vector<8x896xf32>
    %cst_26 = arith.constant 1.000000e+00 : f32
    %55 = vector.broadcast %cst_26 : f32 to vector<8x896xf32>
    %56 = arith.addf %55, %54 : vector<8x896xf32>
    %57 = tpu.reciprocal %56 {approx = true} : vector<8x896xf32> -> vector<8x896xf32>
    %58 = arith.truncf %57 : vector<8x896xf32> to vector<8x896xbf16>
    %c0_27 = arith.constant 0 : index
    %c0_28 = arith.constant 0 : index
    %59 = vector.load %arg10[%c0_27, %c0_28] : memref<8x896xbf16, #tpu.memory_space<vmem>>, vector<8x896xbf16>
    tpu.vector_store %arg10[%c0_27, %c0_28], %58 {strides = array<i32>} : memref<8x896xbf16, #tpu.memory_space<vmem>>, vector<8x896xbf16>,
    %c0_29 = arith.constant 0 : index
    %c0_30 = arith.constant 0 : index
    %60 = vector.load %arg11[%c0_29, %c0_30] : memref<8x32xf32, #tpu.memory_space<vmem>>, vector<8x32xf32>
    tpu.vector_store %arg11[%c0_29, %c0_30], %29 {strides = array<i32>} : memref<8x32xf32, #tpu.memory_space<vmem>>, vector<8x32xf32>,
    return
  }
  func.func @transform_0(%arg0: i32) -> (i32, i32) {
    %c0_i32 = arith.constant 0 : i32
    %c0_i32_0 = arith.constant 0 : i32
    return %arg0, %c0_i32 : i32, i32
  }
  func.func @transform_1(%arg0: i32) -> (i32, i32) {
    %c0_i32 = arith.constant 0 : i32
    %c0_i32_0 = arith.constant 0 : i32
    return %arg0, %c0_i32 : i32, i32
  }
  func.func @transform_2(%arg0: i32) -> (i32, i32) {
    %c0_i32 = arith.constant 0 : i32
    %c0_i32_0 = arith.constant 0 : i32
    %c0_i32_1 = arith.constant 0 : i32
    return %c0_i32, %c0_i32_0 : i32, i32
  }
  func.func @transform_3(%arg0: i32) -> (i32, i32) {
    %c0_i32 = arith.constant 0 : i32
    %c0_i32_0 = arith.constant 0 : i32
    %c0_i32_1 = arith.constant 0 : i32
    return %c0_i32, %c0_i32_0 : i32, i32
  }
  func.func @transform_4(%arg0: i32) -> (i32, i32) {
    %c0_i32 = arith.constant 0 : i32
    %c0_i32_0 = arith.constant 0 : i32
    %c0_i32_1 = arith.constant 0 : i32
    return %c0_i32, %c0_i32_0 : i32, i32
  }
  func.func @transform_5(%arg0: i32) -> (i32, i32) {
    %c0_i32 = arith.constant 0 : i32
    %c0_i32_0 = arith.constant 0 : i32
    %c0_i32_1 = arith.constant 0 : i32
    return %c0_i32, %c0_i32_0 : i32, i32
  }
  func.func @transform_6(%arg0: i32) -> (i32, i32) {
    %c0_i32 = arith.constant 0 : i32
    %c0_i32_0 = arith.constant 0 : i32
    %c0_i32_1 = arith.constant 0 : i32
    return %c0_i32, %c0_i32_0 : i32, i32
  }
  func.func @transform_7(%arg0: i32) -> (i32, i32) {
    %c0_i32 = arith.constant 0 : i32
    %c0_i32_0 = arith.constant 0 : i32
    %c0_i32_1 = arith.constant 0 : i32
    return %c0_i32, %c0_i32_0 : i32, i32
  }
  func.func @transform_8(%arg0: i32) -> (i32, i32) {
    %c0_i32 = arith.constant 0 : i32
    %c0_i32_0 = arith.constant 0 : i32
    %c0_i32_1 = arith.constant 0 : i32
    return %c0_i32, %c0_i32_0 : i32, i32
  }
  func.func @transform_9(%arg0: i32) -> (i32, i32) {
    %c0_i32 = arith.constant 0 : i32
    %c0_i32_0 = arith.constant 0 : i32
    return %arg0, %c0_i32 : i32, i32
  }
  func.func @transform_10(%arg0: i32) -> (i32, i32) {
    %c0_i32 = arith.constant 0 : i32
    %c0_i32_0 = arith.constant 0 : i32
    return %arg0, %c0_i32 : i32, i32
  }
}

</mosaic_0001>

<bundles_post_ra>
// kernel: tpu_custom_call.1
= control target key start
LH: loop header
LB: loop body
LE: loop exit
PB: predicated region body
PF: predicated region fallthrough
CT: control target
= control target key end

     0   :  { %16 = vsyncpa [#allocation3], 0  ;;  %s2363_s0 = inlined_call_operand.vmem [shape: f32[8,784], index: 0, kind: input, shape index: {}]   ;;  %s2364_s1 = inlined_call_operand.hbm [shape: f32[8,16], index: 1, kind: input, shape index: {}]   ;;  %s2365_s2 = inlined_call_operand.hbm [shape: bf16[784,128], index: 2, kind: input, shape index: {}]   ;;  %s2366_s3 = inlined_call_operand.vmem [shape: bf16[128,64], index: 3, kind: input, shape index: {}]   ;;  %s2367_s4 = inlined_call_operand.vmem [shape: bf16[64,32], index: 4, kind: input, shape index: {}]   ;;  %s2368_s5 = inlined_call_operand.hbm [shape: bf16[16,64], index: 5, kind: input, shape index: {}]   ;;  %s2369_s6 = inlined_call_operand.vmem [shape: bf16[64,128], index: 6, kind: input, shape index: {}]   ;;  %s2370_s7 = inlined_call_operand.hbm [shape: bf16[128,896], index: 7, kind: input, shape index: {}]   ;;  %s2371_s8 = inlined_call_operand.vmem [shape: f32[8,896], index: 8, kind: input, shape index: {}]   ;;  %s2372_s9 = inlined_call_operand.hbm [shape: bf16[8,896], index: 9, kind: output, shape index: {0}]   ;;  %s2373_s10 = inlined_call_operand.hbm [shape: f32[8,32], index: 10, kind: output, shape index: {1}]  }
   0x1   :  { %17 = vsyncpa [#allocation6], 0 }
   0x2   :  { %18 = vsyncpa [#allocation9], 0 }
   0x3   :  { %19 = vsyncpa [#allocation4], 0  ;;  %s38_s15 = sshll.u32 %s2365_s2, 4  ;;  %s39_s15 = int_to_ptr.hbm [resolvable:$true] %s38_s15 }
   0x4   :  { %20 = vsyncpa [#allocation12], 0  ;;  %s2176_s16 = smov [#allocation5]   ;;  %s28_s20 = sshll.u32 %s2364_s1, 4  ;;  %s29_s20 = int_to_ptr.hbm [resolvable:$true] %s28_s20 }
   0x5   :  { %s40_s17 = sshll.u32 %s2176_s16, 4  ;;  %s2177_s21 = smov 64   ;;  %s41_s17 = int_to_ptr.vmem [resolvable:$true] %s40_s17 }
   0x6   :  { %s2178_s22 = smov 4   ;;  %s2179_s23 = smov [#allocation2]  }
   0x7   :  { %46 = dma.hbm_to_vmem [thread:$0]  %s39_s15, 6272, %s41_s17, [#allocation6], %s2177_s21, %s2177_s21, %s2178_s22  }
   0x8   :  { %s30_s24 = sshll.u32 %s2179_s23, 4  ;;  %s55_s27 = sshll.u32 %s2368_s5, 4  ;;  %s31_s24 = int_to_ptr.vmem [resolvable:$true] %s30_s24  ;;  %s56_s27 = int_to_ptr.hbm [resolvable:$true] %s55_s27 }
   0x9   :  { %33 = dma.hbm_to_vmem [thread:$0]  %s29_s20, 128, %s31_s24, [#allocation3]  }
   0xa   :  { %s70_s29 = sshll.u32 %s2370_s7, 4  ;;  %s2180_s30 = smov [#allocation7]   ;;  %s71_s29 = int_to_ptr.hbm [resolvable:$true] %s70_s29 }
   0xb   :  { %s57_s11 = sshll.u32 %s2180_s30, 4  ;;  %s2181_s1 = smov [#allocation8]   ;;  %s58_s11 = int_to_ptr.vmem [resolvable:$true] %s57_s11 }
   0xc   :  { %63 = dma.hbm_to_vmem [thread:$0]  %s56_s27, 128, %s58_s11, [#allocation6], %s2177_s21, %s2177_s21, %s2178_s22  }
   0xd   :  { %s72_s12 = sshll.u32 %s2181_s1, 4  ;;  %s2182_s13 = smov 448   ;;  %s73_s12 = int_to_ptr.vmem [resolvable:$true] %s72_s12 }
   0xe   :  { %s2183_s14 = smov 28  }
   0xf   :  { %78 = dma.hbm_to_vmem [thread:$0]  %s71_s29, 7168, %s73_s12, [#allocation9], %s2182_s13, %s2182_s13, %s2183_s14  }
  0x10   :  { %2166 = dma.done.wait [#allocation3], 128  }
  0x11   :  { %2167 = vsyncadd [#allocation3], 4294967168 }
  0x12   :  { %2168 = dma.done.wait [#allocation6], 6400  }
  0x13   :  { %2169 = vsyncadd [#allocation6], 4294960896 }
  0x14   :  { %2170 = dma.done.wait [#allocation9], 7168  }
  0x15   :  { %2171 = vsyncadd [#allocation9], 4294960128  ;;  %v1861_v0 = vld [vmem:[#allocation5 + $0x38] sm:$0xff]  ;;  %v1860_v3 = vld [vmem:[#allocation5 + $0x30] sm:$0xff]  ;;  %vm611_vm0 = vcmask 130048   ;;  %s2184_s27 = smov 16  }
  0x16   :  { %v1869_v1 = vld [vmem:[#allocation5 + $0x78] sm:$0xff]  ;;  %615 = vmatpush.bf16.msra.mxu0 %v1861_v0  ;;  %v1868_v4 = vld [vmem:[#allocation5 + $0x70] sm:$0xff]  ;;  %v1859_v8 = vld [vmem:[#allocation5 + $0x28] sm:$0xff]  ;;  %vm797_vm1 = vcmask 523264   ;;  %vm1325_vm2 = vcmask 261120   ;;  %s1345_s7 = sshll.u32 %s2373_s10, 4  ;;  %s1346_s7 = int_to_ptr.hbm [resolvable:$true] %s1345_s7 }
  0x17   :  { %v1877_v2 = vld [vmem:[#allocation5 + $0xb8] sm:$0xff]  ;;  %628 = vmatpush.bf16.msra.mxu1 %v1869_v1  ;;  %v1876_v5 = vld [vmem:[#allocation5 + $0xb0] sm:$0xff]  ;;  %v1867_v9 = vld [vmem:[#allocation5 + $0x68] sm:$0xff] }
  0x18   :  { %641 = vmatpush.bf16.msra.mxu2 %v1877_v2  ;;  %v1885_v6 = vld [vmem:[#allocation5 + $0xf8] sm:$0xff]  ;;  %v1884_v7 = vld [vmem:[#allocation5 + $0xf0] sm:$0xff]  ;;  %v1875_v10 = vld [vmem:[#allocation5 + $0xa8] sm:$0xff] }
  0x19   :  { %654 = vmatpush.bf16.msra.mxu3 %v1885_v6  ;;  %v1883_v11 = vld [vmem:[#allocation5 + $0xe8] sm:$0xff]  ;;  %v1858_v12 = vld [vmem:[#allocation5 + $0x20] sm:$0xff]  ;;  %v1857_v16 = vld [vmem:[#allocation5 + $0x18] sm:$0xff] }
  0x1a   :  { %616 = vmatpush.bf16.msra.mxu0 %v1860_v3  ;;  %v1866_v13 = vld [vmem:[#allocation5 + $0x60] sm:$0xff]  ;;  %v1865_v17 = vld [vmem:[#allocation5 + $0x58] sm:$0xff]  ;;  %v1856_v20 = vld [vmem:[#allocation5 + $0x10] sm:$0xff] }
  0x1b   :  { %629 = vmatpush.bf16.msra.mxu1 %v1868_v4  ;;  %v1874_v14 = vld [vmem:[#allocation5 + $0xa0] sm:$0xff]  ;;  %v1873_v18 = vld [vmem:[#allocation5 + $0x98] sm:$0xff]  ;;  %v1864_v21 = vld [vmem:[#allocation5 + $0x50] sm:$0xff] }
  0x1c   :  { %642 = vmatpush.bf16.msra.mxu2 %v1876_v5  ;;  %v1882_v15 = vld [vmem:[#allocation5 + $0xe0] sm:$0xff]  ;;  %v1881_v19 = vld [vmem:[#allocation5 + $0xd8] sm:$0xff]  ;;  %v1872_v22 = vld [vmem:[#allocation5 + $0x90] sm:$0xff] }
  0x1d   :  { %655 = vmatpush.bf16.msra.mxu3 %v1884_v7  ;;  %v1880_v23 = vld [vmem:[#allocation5 + $0xd0] sm:$0xff]  ;;  %v1855_v24 = vld [vmem:[#allocation5 + $0x8] sm:$0xff]  ;;  %v1854_v27 = vld [vmem:[#allocation5] sm:$0xff] }
  0x1e   :  { %617 = vmatpush.bf16.msra.mxu0 %v1859_v8  ;;  %v1863_v25 = vld [vmem:[#allocation5 + $0x48] sm:$0xff]  ;;  %v1862_v29 = vld [vmem:[#allocation5 + $0x40] sm:$0xff]  ;;  %v301_v30 = vld [vmem:[%s2363_s0] sm:$0xff] }
  0x1f   :  { %630 = vmatpush.bf16.msra.mxu1 %v1867_v9  ;;  %v1871_v26 = vld [vmem:[#allocation5 + $0x88] sm:$0xff]  ;;  %v302_v31 = vld [vmem:[%s2363_s0 + $0x8] sm:$0xff]  ;;  %v1893_v32 = vld [vmem:[#allocation5 + $0x138] sm:$0xff]  ;;  %v309_v36 = vpack.c.bf16 %v301_v30, %v301_v30 }
  0x20   :  { %643 = vmatpush.bf16.msra.mxu2 %v1875_v10  ;;  %v1879_v28 = vld [vmem:[#allocation5 + $0xc8] sm:$0xff]  ;;  %v1901_v33 = vld [vmem:[#allocation5 + $0x178] sm:$0xff]  ;;  %v1870_v34 = vld [vmem:[#allocation5 + $0x80] sm:$0xff]  ;;  %v310_v37 = vpack.c.bf16 %v302_v31, %v302_v31 }
  0x21   :  { %656 = vmatpush.bf16.msra.mxu3 %v1883_v11  ;;  %v303_v35 = vld [vmem:[%s2363_s0 + $0x10] sm:$0xff]  ;;  %v1878_v38 = vld [vmem:[#allocation5 + $0xc0] sm:$0xff]  ;;  %v304_v40 = vld [vmem:[%s2363_s0 + $0x18] sm:$0xff] }
  0x22   :  { %618 = vmatpush.bf16.msra.mxu0 %v1858_v12  ;;  %v1902_v39 = vld [vmem:[#allocation5 + $0x180] sm:$0xff]  ;;  %v1892_v41 = vld [vmem:[#allocation5 + $0x130] sm:$0xff]  ;;  %v311_v43 = vpack.c.bf16 %v303_v35, %v303_v35  ;;  %v312_v44 = vpack.c.bf16 %v304_v40, %v304_v40  ;;  %v1891_v45 = vld [vmem:[#allocation5 + $0x128] sm:$0xff] }
  0x23   :  { %631 = vmatpush.bf16.msra.mxu1 %v1866_v13  ;;  %v1900_v42 = vld [vmem:[#allocation5 + $0x170] sm:$0xff]  ;;  %v1899_v46 = vld [vmem:[#allocation5 + $0x168] sm:$0xff]  ;;  %v1890_v47 = vld [vmem:[#allocation5 + $0x120] sm:$0xff] }
  0x24   :  { %644 = vmatpush.bf16.msra.mxu2 %v1874_v14  ;;  %v1898_v48 = vld [vmem:[#allocation5 + $0x160] sm:$0xff]  ;;  %v1889_v49 = vld [vmem:[#allocation5 + $0x118] sm:$0xff]  ;;  %v307_v51 = vld [vmem:[%s2363_s0 + $0x30] sm:$0xff] }
  0x25   :  { %657 = vmatpush.bf16.msra.mxu3 %v1882_v15  ;;  %v1897_v50 = vld [vmem:[#allocation5 + $0x158] sm:$0xff]  ;;  %v1888_v52 = vld [vmem:[#allocation5 + $0x110] sm:$0xff]  ;;  %v315_v54 = vpack.c.bf16 %v307_v51, %v307_v51  ;;  %v1887_v55 = vld [vmem:[#allocation5 + $0x108] sm:$0xff] }
  0x26   :  { %619 = vmatpush.bf16.msra.mxu0 %v1857_v16  ;;  %v1896_v53 = vld [vmem:[#allocation5 + $0x150] sm:$0xff]  ;;  %v1895_v56 = vld [vmem:[#allocation5 + $0x148] sm:$0xff]  ;;  %v1886_v57 = vld [vmem:[#allocation5 + $0x100] sm:$0xff] }
  0x27   :  { %632 = vmatpush.bf16.msra.mxu1 %v1865_v17  ;;  %v1894_v58 = vld [vmem:[#allocation5 + $0x140] sm:$0xff]  ;;  %v305_v59 = vld [vmem:[%s2363_s0 + $0x20] sm:$0xff]  ;;  %v1910_v63 = vld [vmem:[%s2366_s3 + $0x38] sm:$0xff] }
  0x28   :  { %645 = vmatpush.bf16.msra.mxu2 %v1873_v18  ;;  %v306_v60 = vld [vmem:[%s2363_s0 + $0x28] sm:$0xff]  ;;  %v313_v61 = vpack.c.bf16 %v305_v59, %v305_v59  ;;  %v1909_v0 = vld [vmem:[%s2366_s3 + $0x30] sm:$0xff]  ;;  %v1907_v2 = vld [vmem:[%s2366_s3 + $0x20] sm:$0xff] }
  0x29   :  { %658 = vmatpush.bf16.msra.mxu3 %v1881_v19  ;;  %v314_v62 = vpack.c.bf16 %v306_v60, %v306_v60  ;;  %v1908_v1 = vld [vmem:[%s2366_s3 + $0x28] sm:$0xff]  ;;  %v1906_v3 = vld [vmem:[%s2366_s3 + $0x18] sm:$0xff]  ;;  %v1905_v6 = vld [vmem:[%s2366_s3 + $0x10] sm:$0xff] }
  0x2a   :  { %620 = vmatpush.bf16.msra.mxu0 %v1856_v20  ;;  %v1904_v7 = vld [vmem:[%s2366_s3 + $0x8] sm:$0xff]  ;;  %v1903_v8 = vld [vmem:[%s2366_s3] sm:$0xff]  ;;  %v1914_v15 = vld [vmem:[%s2367_s4 + $0x18] sm:$0xff] }
  0x2b   :  { %633 = vmatpush.bf16.msra.mxu1 %v1864_v21  ;;  %v2304_v11 = vld [vmem:[%s2371_s8] sm:$0xff]  ;;  %v1913_v16 = vld [vmem:[%s2367_s4 + $0x10] sm:$0xff]  ;;  %v1912_v20 = vld [vmem:[%s2367_s4 + $0x8] sm:$0xff] }
  0x2c   :  { %646 = vmatpush.bf16.msra.mxu2 %v1872_v22  ;;  %v316_v14 = vperm.slane %v2304_v11, 0  ;;  %v1911_v35 = vld [vmem:[%s2367_s4] sm:$0xff]  ;;  %s2185_s4 = smov 112  }
  0x2d   :  { %659 = vmatpush.bf16.msra.mxu3 %v1880_v23  ;;  %v1916_v59 = vld [vmem:[%s2369_s6] sm:$0xff] }
  0x2e   :  { %621 = vmatpush.bf16.msra.mxu0 %v1855_v24  ;;  %v1828_v60 = vld [vmem:[#allocation8 + $0x188] sm:$0xf] }
  0x2f   :  { %634 = vmatpush.bf16.msra.mxu1 %v1863_v25 }
  0x30   :  { %647 = vmatpush.bf16.msra.mxu2 %v1871_v26 }
  0x31   :  { %660 = vmatpush.bf16.msra.mxu3 %v1879_v28 }
  0x32   :  { %622 = vmatpush.bf16.msra.mxu0 %v1854_v27 }
  0x33   :  { %635 = vmatpush.bf16.msra.mxu1 %v1862_v29 }
  0x34   :  { %648 = vmatpush.bf16.msra.mxu2 %v1870_v34 }
  0x35   :  { %623 = vmatmul.bf16.vlgmr.msra.gmra.mxu0 %v309_v36  ;;  %661 = vmatpush.bf16.msra.mxu3 %v1878_v38  ;;  %v308_v36 = vld [vmem:[#allocation2] sm:$0xff] }
  0x36   :  { %667 = vmatpush.bf16.msrb.mxu0 %v1893_v32  ;;  %636 = vmatmul.bf16.vlgmr.msra.gmra.mxu1 %v310_v37  ;;  %v708_v37 = vperm.slane %v2304_v11, 1 }
  0x37   :  { %680 = vmatpush.bf16.msrb.mxu1 %v1901_v33  ;;  %649 = vmatmul.bf16.vlgmr.msra.gmra.mxu2 %v311_v43  ;;  %v1915_v43 = vld [vmem:[#allocation7] sm:$0xff] }
  0x38   :  { %700 = vmatpush.bf16.msrb.mxu2 %v1902_v39  ;;  %662 = vmatmul.bf16.vlgmr.msra.gmra.mxu3 %v312_v44  ;;  %v772_v44 = vperm.slane %v2304_v11, 2 }
  0x39   :  { %757 = vmatpush.bf16.msrb.mxu3 %v1910_v63  ;;  %818 = vrot.lane.b32.xlu0 %v308_v36, %s2184_s27  ;;  %v1944_v36 = vld [vmem:[#allocation8 + $0xc0] sm:$0xf0] }
  0x3a   :  { %668 = vmatpush.bf16.msrb.mxu0 %v1892_v41 }
  0x3b   :  { %681 = vmatpush.bf16.msrb.mxu1 %v1900_v42 }
  0x3c   :  { %805 = vmatpush.bf16.msra.mxu2 %v1914_v15  ;;  %v1772_v15 = vld [vmem:[#allocation8 + $0x118] sm:$0xf] }
  0x3d   :  { %758 = vmatpush.bf16.msrb.mxu3 %v1909_v0  ;;  %v1830_v0 = vld [vmem:[#allocation8 + $0x1a4] sm:$0xf0] }
  0x3e   :  { %669 = vmatpush.bf16.msrb.mxu0 %v1891_v45 }
  0x3f   :  { %682 = vmatpush.bf16.msrb.mxu1 %v1899_v46 }
  0x40   :  { %806 = vmatpush.bf16.msra.mxu2 %v1913_v16  ;;  %v1958_v16 = vld [vmem:[#allocation8 + $0x130] sm:$0xf0] }
  0x41   :  { %759 = vmatpush.bf16.msrb.mxu3 %v1908_v1  ;;  %v1836_v1 = vld [vmem:[#allocation8 + $0x190] sm:$0xf] }
  0x42   :  { %670 = vmatpush.bf16.msrb.mxu0 %v1890_v47 }
  0x43   :  { %683 = vmatpush.bf16.msrb.mxu1 %v1898_v48 }
  0x44   :  { %807 = vmatpush.bf16.msra.mxu2 %v1912_v20  ;;  %v1959_v20 = vld [vmem:[#allocation8 + $0x138] sm:$0xf0] }
  0x45   :  { %760 = vmatpush.bf16.msrb.mxu3 %v1907_v2  ;;  %v1973_v2 = vld [vmem:[#allocation8 + $0x1a8] sm:$0xf0] }
  0x46   :  { %671 = vmatpush.bf16.msrb.mxu0 %v1889_v49 }
  0x47   :  { %684 = vmatpush.bf16.msrb.mxu1 %v1897_v50  ;;  %1558 = vmatmul.msk.bf16.vlgmr.msrb.gmra.mxu2 %vm611_vm0, %v315_v54 }
  0x48   :  { %808 = vmatpush.bf16.msra.mxu2 %v1911_v35  ;;  %v1716_v35 = vld [vmem:[#allocation8 + $0xa8] sm:$0xf] }
  0x49   :  { %761 = vmatpush.bf16.msrb.mxu3 %v1906_v3 }
  0x4a   :  { %672 = vmatpush.bf16.msrb.mxu0 %v1888_v52 }
  0x4b   :  { %685 = vmatpush.bf16.msrb.mxu1 %v1896_v53  ;;  %v1919_v53 = vld [vmem:[%s2369_s6 + $0x18] sm:$0xff] }
  0x4d   :  { %762 = vmatpush.bf16.msrb.mxu3 %v1905_v6  ;;  %v1965_v6 = vld [vmem:[#allocation8 + $0x168] sm:$0xf0] }
  0x4e   :  { %673 = vmatpush.bf16.msrb.mxu0 %v1887_v55 }
  0x4f   :  { %686 = vmatpush.bf16.msrb.mxu1 %v1895_v56 }
  0x51   :  { %763 = vmatpush.bf16.msrb.mxu3 %v1904_v7  ;;  %v1962_v7 = vld [vmem:[#allocation8 + $0x154] sm:$0xf] }
  0x52   :  { %674 = vmatpush.bf16.msrb.mxu0 %v1886_v57  ;;  %v1918_v57 = vld [vmem:[%s2369_s6 + $0x10] sm:$0xff] }
  0x53   :  { %687 = vmatpush.bf16.msrb.mxu1 %v1894_v58  ;;  %v1917_v58 = vld [vmem:[%s2369_s6 + $0x8] sm:$0xff]  ;;  %s2186_s6 = smov [#allocation11]  }
  0x54   :  { %s1343_s13 = sshll.u32 %s2186_s6, 4  ;;  %s1344_s13 = int_to_ptr.vmem [resolvable:$true] %s1343_s13 }
  0x55   :  { %675 = vmatmul.bf16.vlgmr.msrb.gmra.mxu0 %v313_v61  ;;  %764 = vmatpush.bf16.msrb.mxu3 %v1903_v8  ;;  %v1972_v61 = vld [vmem:[#allocation8 + $0x1a0] sm:$0xf0] }
  0x56   :  { %688 = vmatmul.bf16.vlgmr.msrb.gmra.mxu1 %v314_v62  ;;  %v1969_v62 = vld [vmem:[#allocation8 + $0x18c] sm:$0xf]  ;;  %v1829_v63 = vor.u32 %v1972_v61, %v1828_v60  ;;  %v1660_v61 = vld [vmem:[#allocation8 + $0x38] sm:$0xf] }
  0x57   :  { %845 = vmatpush.bf16.msra.mxu1 %v1915_v43  ;;  %v1833_v3 = vor.u32 %v1969_v62, %v1830_v0  ;;  %v1930_v62 = vld [vmem:[#allocation8 + $0x50] sm:$0xf0] }
  0x58   :  { %1191 = vmatpush.bf16.msrb.mxu2 %v1829_v63 }
  0x59   :  { %1204 = vmatpush.bf16.msra.mxu3 %v1833_v3  ;;  %v1927_v3 = vld [vmem:[#allocation8 + $0x3c] sm:$0xf] }
  0x5b   :  { %885 = vmatpush.bf16.msrb.mxu1 %v1919_v53 }
  0x5f   :  { %886 = vmatpush.bf16.msrb.mxu1 %v1918_v57  ;;  %v1690_v57 = vld [vmem:[#allocation8 + $0x8c] sm:$0xf0] }
  0x63   :  { %887 = vmatpush.bf16.msrb.mxu1 %v1917_v58  ;;  %v1696_v58 = vld [vmem:[#allocation8 + $0x78] sm:$0xf] }
  0x67   :  { %888 = vmatpush.bf16.msrb.mxu1 %v1916_v59  ;;  %v1938_v59 = vld [vmem:[#allocation8 + $0x90] sm:$0xf0] }
  0xab   :  { %v819_v50 = vpop.permute.xlu0 %818 }
  0xb2   :  { %v624_v4 = vpop.f32.mrf.mxu0 }
  0xb3   :  { %v637_v5 = vpop.f32.mrf.mxu1  ;;  %v625_v17 = vadd.f32 %v624_v4, %v316_v14  ;;  %v1837_v4 = vor.u32 %v1973_v2, %v1836_v1  ;;  %v1697_v2 = vor.u32 %v1938_v59, %v1696_v58  ;;  %v1961_v58 = vld [vmem:[#allocation8 + $0x148] sm:$0xf0] }
  0xb5   :  { %v638_v21 = vadd.f32 %v637_v5, %v625_v17  ;;  %v1800_v5 = vld [vmem:[#allocation8 + $0x150] sm:$0xf]  ;;  %1217 = vmatpush.bf16.msra.mxu0 %v1837_v4  ;;  %v1955_v17 = vld [vmem:[#allocation8 + $0x11c] sm:$0xf]  ;;  %v1942_v4 = vld [vmem:[#allocation8 + $0xb4] sm:$0xf] }
  0xb6   :  { %v1801_v8 = vor.u32 %v1965_v6, %v1800_v5  ;;  %v1726_v5 = vld [vmem:[#allocation8 + $0xcc] sm:$0xf0] }
  0xb8   :  { %1192 = vmatpush.bf16.msrb.mxu2 %v1801_v8  ;;  %v1668_v8 = vld [vmem:[#allocation8 + $0x40] sm:$0xf] }
  0xba   :  { %v626_v9 = vpop.f32.mrf.mxu0  ;;  %v650_v12 = vpop.f32.mrf.mxu2 }
  0xbb   :  { %v639_v10 = vpop.f32.mrf.mxu1  ;;  %v663_v13 = vpop.f32.mrf.mxu3  ;;  %v651_v22 = vadd.f32 %v650_v12, %v638_v21  ;;  %v1802_v9 = vld [vmem:[#allocation8 + $0x16c] sm:$0xf0]  ;;  %v1966_v12 = vld [vmem:[#allocation8 + $0x170] sm:$0xf0]  ;;  %v1773_v21 = vor.u32 %v1958_v16, %v1772_v15 }
  0xbc   :  { %v1808_v10 = vld [vmem:[#allocation8 + $0x158] sm:$0xf] }
  0xbd   :  { %v664_v24 = vadd.f32 %v663_v13, %v651_v22  ;;  %v1805_v13 = vor.u32 %v1962_v7, %v1802_v9  ;;  %v1809_v14 = vor.u32 %v1966_v12, %v1808_v10  ;;  %v1744_v22 = vld [vmem:[#allocation8 + $0xe0] sm:$0xf]  ;;  %1193 = vmatpush.bf16.msrb.mxu2 %v1773_v21  ;;  %v1662_v7 = vld [vmem:[#allocation8 + $0x54] sm:$0xf0]  ;;  %v1931_v9 = vld [vmem:[#allocation8 + $0x58] sm:$0xf0]  ;;  %v1661_v10 = vor.u32 %v1930_v62, %v1660_v61 }
  0xbe   :  { %v1632_v12 = vld [vmem:[#allocation8] sm:$0xf]  ;;  %v1665_v15 = vor.u32 %v1927_v3, %v1662_v7  ;;  %v1669_v16 = vor.u32 %v1931_v9, %v1668_v8  ;;  %v1640_v21 = vld [vmem:[#allocation8 + $0x8] sm:$0xf]  ;;  %v1760_v62 = vld [vmem:[#allocation8 + $0xf0] sm:$0xf] }
  0xbf   :  { %1205 = vmatpush.bf16.msra.mxu3 %v1805_v13  ;;  %1218 = vmatpush.bf16.msra.mxu0 %v1809_v14  ;;  %v1923_v13 = vld [vmem:[#allocation8 + $0x18] sm:$0xf0]  ;;  %v1729_v14 = vor.u32 %v1942_v4, %v1726_v5  ;;  %v1642_v61 = vld [vmem:[#allocation8 + $0x24] sm:$0xf0]  ;;  %v1768_v5 = vld [vmem:[#allocation8 + $0xf8] sm:$0xf] }
  0xc0   :  { %v1732_v8 = vld [vmem:[#allocation8 + $0xb8] sm:$0xf]  ;;  %v1946_v9 = vld [vmem:[#allocation8 + $0xd0] sm:$0xf0] }
  0xc2   :  { %v652_v18 = vpop.f32.mrf.mxu2 }
  0xc3   :  { %v665_v19 = vpop.f32.mrf.mxu3  ;;  %v1774_v18 = vld [vmem:[#allocation8 + $0x134] sm:$0xf0] }
  0xc4   :  { %v1780_v19 = vld [vmem:[#allocation8 + $0x120] sm:$0xf] }
  0xca   :  { %v702_v23 = vpop.f32.mrf.mxu2 }
  0xd2   :  { %v676_v25 = vpop.f32.mrf.mxu0  ;;  %v704_v29 = vpop.f32.mrf.mxu2 }
  0xd3   :  { %v689_v26 = vpop.f32.mrf.mxu1  ;;  %v677_v27 = vadd.f32 %v676_v25, %v664_v24  ;;  %v1777_v24 = vor.u32 %v1955_v17, %v1774_v18  ;;  %v1781_v25 = vor.u32 %v1959_v20, %v1780_v19  ;;  %v1746_v29 = vld [vmem:[#allocation8 + $0xfc] sm:$0xf0]  ;;  %v1920_v17 = vld [vmem:[#allocation8 + $0x4] sm:$0xf]  ;;  %v1935_v18 = vld [vmem:[#allocation8 + $0x7c] sm:$0xf] }
  0xd4   :  { %v1698_v19 = vld [vmem:[#allocation8 + $0x94] sm:$0xf0]  ;;  %v1634_v20 = vld [vmem:[#allocation8 + $0x1c] sm:$0xf0] }
  0xd5   :  { %v690_v28 = vadd.f32 %v689_v26, %v677_v27  ;;  %v1948_v26 = vld [vmem:[#allocation8 + $0xe4] sm:$0xf]  ;;  %v1970_v27 = vld [vmem:[#allocation8 + $0x194] sm:$0xf]  ;;  %1206 = vmatpush.bf16.msra.mxu3 %v1777_v24  ;;  %1219 = vmatpush.bf16.msra.mxu0 %v1781_v25  ;;  %v1971_v25 = vld [vmem:[#allocation8 + $0x19c] sm:$0xf] }
  0xd6   :  { %v1974_v24 = vld [vmem:[#allocation8 + $0x1b0] sm:$0xf0] }
  0xd7   :  { %v703_v30 = vadd.f32 %v702_v23, %v690_v28  ;;  %v1951_v23 = vld [vmem:[#allocation8 + $0xf8] sm:$0xf0]  ;;  %v1838_v28 = vld [vmem:[#allocation8 + $0x1ac] sm:$0xf0] }
  0xd9   :  { %1988 = vtanh.f32 %v703_v30  ;;  %v1752_v30 = vld [vmem:[#allocation8 + $0xe8] sm:$0xf] }
  0xda   :  { %v678_v31 = vpop.f32.mrf.mxu0 }
  0xdb   :  { %v691_v32 = vpop.f32.mrf.mxu1  ;;  %v1952_v31 = vld [vmem:[#allocation8 + $0x100] sm:$0xf0] }
  0xdc   :  { %v1841_v32 = vor.u32 %v1970_v27, %v1838_v28  ;;  %v1846_v27 = vld [vmem:[#allocation8 + $0x1b4] sm:$0xf0]  ;;  %v1852_v28 = vld [vmem:[#allocation8 + $0x1a0] sm:$0xf] }
  0xdf   :  { %v1989_v33 = vpop.eup %1988 }
  0xe0   :  { %v707_v34 = vpack.c.bf16 %v1989_v33, %v1989_v33  ;;  %v1963_v33 = vld [vmem:[#allocation8 + $0x15c] sm:$0xf] }
  0xe2   :  { %765 = vmatmul.bf16.vlgmr.msrb.gmra.mxu3 %v707_v34  ;;  %v1745_v34 = vor.u32 %v1951_v23, %v1744_v22  ;;  %v1924_v22 = vld [vmem:[#allocation8 + $0x20] sm:$0xf0]  ;;  %v1844_v23 = vld [vmem:[#allocation8 + $0x198] sm:$0xf] }
  0xe4   :  { %1194 = vmatpush.bf16.msrb.mxu2 %v1745_v34  ;;  %v1641_v34 = vor.u32 %v1924_v22, %v1640_v21  ;;  %v1706_v22 = vld [vmem:[#allocation8 + $0x9c] sm:$0xf0] }
 0x165   :  { %v766_v38 = vpop.f32.mrf.mxu3 }
 0x166   :  { %v767_v39 = vadd.f32 %v766_v38, %v708_v37  ;;  %v1810_v37 = vld [vmem:[#allocation8 + $0x174] sm:$0xf0]  ;;  %v1749_v38 = vor.u32 %v1948_v26, %v1746_v29  ;;  %v1633_v26 = vor.u32 %v1923_v13, %v1632_v12  ;;  %v1975_v29 = vld [vmem:[#allocation8 + $0x1b8] sm:$0xf0]  ;;  %v1733_v12 = vor.u32 %v1946_v9, %v1732_v8 }
 0x167   :  { %v1813_v43 = vor.u32 %v1963_v33, %v1810_v37  ;;  %v1849_v37 = vor.u32 %v1971_v25, %v1846_v27  ;;  %v1734_v13 = vld [vmem:[#allocation8 + $0xd4] sm:$0xf0]  ;;  %v1676_v27 = vld [vmem:[#allocation8 + $0x48] sm:$0xf] }
 0x168   :  { %v770_v40 = vmax.f32 %v767_v39, 0.0  ;;  %v1753_v39 = vor.u32 %v1952_v31, %v1752_v30  ;;  %1207 = vmatpush.bf16.msra.mxu3 %v1749_v38  ;;  %v1701_v30 = vor.u32 %v1935_v18, %v1698_v19  ;;  %v1853_v38 = vor.u32 %v1975_v29, %v1852_v28  ;;  %v1704_v18 = vld [vmem:[#allocation8 + $0x80] sm:$0xf]  ;;  %v1939_v19 = vld [vmem:[#allocation8 + $0x98] sm:$0xf0] }
 0x169   :  { %v1705_v21 = vor.u32 %v1939_v19, %v1704_v18  ;;  %v1932_v28 = vld [vmem:[#allocation8 + $0x60] sm:$0xf0]  ;;  %v1929_v29 = vld [vmem:[#allocation8 + $0x4c] sm:$0xf] }
 0x16a   :  { %v771_v41 = vpack.c.bf16 %v770_v40, %v770_v40  ;;  %v1941_v40 = vld [vmem:[#allocation8 + $0xac] sm:$0xf]  ;;  %1220 = vmatpush.bf16.msra.mxu0 %v1753_v39  ;;  %v1816_v39 = vld [vmem:[#allocation8 + $0x160] sm:$0xf] }
 0x16c   :  { %1607 = vmatmul.msk.bf16.vlgmr.msra.gmra.mxu2 %vm797_vm1, %v771_v41  ;;  %v1718_v41 = vld [vmem:[#allocation8 + $0xc4] sm:$0xf0] }
 0x16d   :  { %v768_v42 = vpop.f32.mrf.mxu3 }
 0x16e   :  { %v1724_v42 = vld [vmem:[#allocation8 + $0xb0] sm:$0xf] }
 0x1ef   :  { %v810_v45 = vpop.f32.mrf.mxu2 }
 0x1f0   :  { %v811_v46 = vadd.f32 %v810_v45, %v772_v44  ;;  %v1945_v44 = vld [vmem:[#allocation8 + $0xc8] sm:$0xf0]  ;;  %v1956_v45 = vld [vmem:[#allocation8 + $0x124] sm:$0xf] }
 0x1f1   :  { %v1725_v53 = vor.u32 %v1945_v44, %v1724_v42  ;;  %v1818_v42 = vld [vmem:[#allocation8 + $0x17c] sm:$0xf0]  ;;  %v1968_v44 = vld [vmem:[#allocation8 + $0x180] sm:$0xf0] }
 0x1f2   :  { %v814_v47 = vmul.f32 0.5, %v811_v46  ;;  %1326 = vst.msk [vmem:[#allocation11] sm:$0xff] %vm1325_vm2, %v811_v46 }
 0x1f3   :  { %1221 = vmatpush.bf16.msra.mxu0 %v1725_v53  ;;  %v1957_v53 = vld [vmem:[#allocation8 + $0x12c] sm:$0xf]  ;;  %1348 = dma.vmem_to_hbm [thread:$0]  %s1344_s13, 128, %s1346_s7, [#allocation12]  }
 0x1f4   :  { %v815_v48 = vmul.f32 1.442695, %v814_v47  ;;  %v828_v47 = vperm.slane %v2304_v11, 3 }
 0x1f6   :  { %1990 = vpow2.f32 %v815_v48  ;;  %v1717_v48 = vor.u32 %v1944_v36, %v1716_v35  ;;  %v1845_v35 = vor.u32 %v1974_v24, %v1844_v23  ;;  %v1712_v23 = vld [vmem:[#allocation8 + $0x88] sm:$0xf]  ;;  %v1940_v24 = vld [vmem:[#allocation8 + $0xa0] sm:$0xf0] }
 0x1f7   :  { %v812_v49 = vpop.f32.mrf.mxu2  ;;  %1222 = vmatpush.bf16.msra.mxu0 %v1697_v2  ;;  %v1762_v2 = vld [vmem:[#allocation8 + $0x10c] sm:$0xf0] }
 0x1f8   :  { %v1688_v49 = vld [vmem:[#allocation8 + $0x70] sm:$0xf]  ;;  %1195 = vmatpush.bf16.msrb.mxu2 %v1717_v48  ;;  %v1928_v48 = vld [vmem:[#allocation8 + $0x44] sm:$0xf] }
 0x1fb   :  { %1223 = vmatpush.bf16.msra.mxu0 %v1669_v16 }
 0x1fc   :  { %v1991_v51 = vpop.eup %1990 }
 0x1fd   :  { %v821_v52 = vmul.f32 %v1991_v51, %v819_v50  ;;  %v1937_v50 = vld [vmem:[#allocation8 + $0x88] sm:$0xf0] }
 0x1fe   :  { %v1689_v60 = vor.u32 %v1937_v50, %v1688_v49  ;;  %v1670_v49 = vld [vmem:[#allocation8 + $0x5c] sm:$0xf0]  ;;  %v1788_v50 = vld [vmem:[#allocation8 + $0x128] sm:$0xf] }
 0x1ff   :  { %823 = vrot.lane.b32.xlu0 %v821_v52, %s2185_s4  ;;  %v1721_v52 = vor.u32 %v1941_v40, %v1718_v41  ;;  %v1967_v40 = vld [vmem:[#allocation8 + $0x178] sm:$0xf0]  ;;  %v1964_v41 = vld [vmem:[#allocation8 + $0x164] sm:$0xf]  ;;  %1224 = vmatpush.bf16.msra.mxu0 %v1641_v34  ;;  %s1334_s4 = sshll.u32 %s2372_s9, 4  ;;  %s1335_s4 = int_to_ptr.hbm [resolvable:$true] %s1334_s4 }
 0x200   :  { %1196 = vmatpush.bf16.msrb.mxu2 %v1689_v60  ;;  %v1921_v60 = vld [vmem:[#allocation8 + $0xc] sm:$0xf] }
 0x201   :  { %1208 = vmatpush.bf16.msra.mxu3 %v1721_v52  ;;  %v1960_v52 = vld [vmem:[#allocation8 + $0x140] sm:$0xf0] }
 0x203   :  { %1269 = vmatpush.bf16.msrb.mxu0 %v1853_v38  ;;  %v1922_v38 = vld [vmem:[#allocation8 + $0x14] sm:$0xf] }
 0x204   :  { %1197 = vmatpush.bf16.msrb.mxu2 %v1661_v10  ;;  %v1943_v10 = vld [vmem:[#allocation8 + $0xbc] sm:$0xf] }
 0x205   :  { %v1737_v16 = vor.u32 %v1943_v10, %v1734_v13 }
 0x208   :  { %1198 = vmatpush.bf16.msrb.mxu2 %v1633_v26  ;;  %v1713_v26 = vor.u32 %v1940_v24, %v1712_v23 }
 0x20c   :  { %1243 = vmatpush.bf16.msra.mxu2 %v1845_v35 }
 0x271   :  { %v824_v54 = vpop.permute.xlu0 %823 }
 0x272   :  { %v826_v55 = vadd.f32 %v824_v54, %v811_v46  ;;  %v1782_v46 = vld [vmem:[#allocation8 + $0x13c] sm:$0xf0]  ;;  %v1934_v54 = vld [vmem:[#allocation8 + $0x74] sm:$0xf] }
 0x273   :  { %v1785_v51 = vor.u32 %v1956_v45, %v1782_v46  ;;  %v1693_v1 = vor.u32 %v1934_v54, %v1690_v57  ;;  %v1817_v45 = vor.u32 %v1967_v40, %v1816_v39  ;;  %v1821_v46 = vor.u32 %v1964_v41, %v1818_v42  ;;  %v1790_v54 = vld [vmem:[#allocation8 + $0x144] sm:$0xf0]  ;;  %v1796_v57 = vld [vmem:[#allocation8 + $0x130] sm:$0xf]  ;;  %v1656_v40 = vld [vmem:[#allocation8 + $0x18] sm:$0xf] }
 0x274   :  { %v827_v56 = vpack.c.bf16 %v826_v55, %v826_v55  ;;  %v1949_v55 = vld [vmem:[#allocation8 + $0xec] sm:$0xf]  ;;  %v1797_v59 = vor.u32 %v1961_v58, %v1796_v57  ;;  %v1650_v39 = vld [vmem:[#allocation8 + $0x2c] sm:$0xf0]  ;;  %v1926_v41 = vld [vmem:[#allocation8 + $0x30] sm:$0xf0] }
 0x275   :  { %1209 = vmatpush.bf16.msra.mxu3 %v1693_v1  ;;  %1244 = vmatpush.bf16.msra.mxu2 %v1817_v45  ;;  %v1950_v1 = vld [vmem:[#allocation8 + $0xf4] sm:$0xf]  ;;  %v853_v45 = vperm.slane %v2304_v11, 4 }
 0x276   :  { %1612 = vmatmul.msk.bf16.vlgmr.msra.gmra.mxu1 %vm611_vm0, %v827_v56  ;;  %v1754_v56 = vld [vmem:[#allocation8 + $0x104] sm:$0xf0]  ;;  %v1765_v4 = vor.u32 %v1950_v1, %v1762_v2 }
 0x277   :  { %1230 = vmatpush.bf16.msra.mxu1 %v1841_v32  ;;  %v1757_v63 = vor.u32 %v1949_v55, %v1754_v56  ;;  %v1637_v32 = vor.u32 %v1920_v17, %v1634_v20  ;;  %v1789_v55 = vor.u32 %v1960_v52, %v1788_v50  ;;  %v1793_v56 = vor.u32 %v1957_v53, %v1790_v54  ;;  %v1936_v20 = vld [vmem:[#allocation8 + $0x84] sm:$0xf] }
 0x278   :  { %v1709_v25 = vor.u32 %v1936_v20, %v1706_v22  ;;  %v101_v52 = vld [vmem:[%s2371_s8 + $0x18] sm:$0xff]  ;;  %v102_v20 = vld [vmem:[%s2371_s8 + $0x20] sm:$0xff] }
 0x279   :  { %1210 = vmatpush.bf16.msra.mxu3 %v1665_v15  ;;  %1245 = vmatpush.bf16.msra.mxu2 %v1789_v55  ;;  %v1947_v15 = vld [vmem:[#allocation8 + $0xd8] sm:$0xf0]  ;;  %v899_v54 = vperm.slane %v101_v52, 5  ;;  %v99_v55 = vld [vmem:[%s2371_s8 + $0x8] sm:$0xff] }
 0x27b   :  { %1231 = vmatpush.bf16.msra.mxu1 %v1813_v43  ;;  %v1824_v43 = vld [vmem:[#allocation8 + $0x168] sm:$0xf] }
 0x27d   :  { %1211 = vmatpush.bf16.msra.mxu3 %v1637_v32  ;;  %v1933_v32 = vld [vmem:[#allocation8 + $0x68] sm:$0xf0] }
 0x27f   :  { %1232 = vmatpush.bf16.msra.mxu1 %v1785_v51  ;;  %v1673_v51 = vor.u32 %v1928_v48, %v1670_v49 }
 0x281   :  { %1256 = vmatpush.bf16.msrb.mxu3 %v1849_v37  ;;  %v1925_v37 = vld [vmem:[#allocation8 + $0x28] sm:$0xf0] }
 0x283   :  { %1233 = vmatpush.bf16.msra.mxu1 %v1757_v63  ;;  %v1645_v63 = vor.u32 %v1921_v60, %v1642_v61  ;;  %v896_v60 = vperm.slane %v2304_v11, 5  ;;  %v897_v61 = vperm.slane %v99_v55, 5  ;;  %v104_v11 = vld [vmem:[%s2371_s8 + $0x30] sm:$0xff] }
 0x285   :  { %1257 = vmatpush.bf16.msrb.mxu3 %v1821_v46 }
 0x287   :  { %1234 = vmatpush.bf16.msra.mxu1 %v1729_v14  ;;  %v1740_v14 = vld [vmem:[#allocation8 + $0xc0] sm:$0xf] }
 0x288   :  { %v1741_v17 = vor.u32 %v1947_v15, %v1740_v14 }
 0x289   :  { %1258 = vmatpush.bf16.msrb.mxu3 %v1793_v56 }
 0x28b   :  { %1235 = vmatpush.bf16.msra.mxu1 %v1701_v30  ;;  %v1678_v30 = vld [vmem:[#allocation8 + $0x64] sm:$0xf0] }
 0x28c   :  { %v1681_v34 = vor.u32 %v1929_v29, %v1678_v30 }
 0x28d   :  { %1259 = vmatpush.bf16.msrb.mxu3 %v1765_v4 }
 0x28f   :  { %1236 = vmatpush.bf16.msra.mxu1 %v1673_v51  ;;  %v100_v51 = vld [vmem:[%s2371_s8 + $0x10] sm:$0xff] }
 0x290   :  { %v898_v53 = vperm.slane %v100_v51, 5 }
 0x291   :  { %1260 = vmatpush.bf16.msrb.mxu3 %v1737_v16  ;;  %v902_v16 = vperm.slane %v104_v11, 5 }
 0x293   :  { %1237 = vmatpush.bf16.msra.mxu1 %v1645_v63 }
 0x295   :  { %1261 = vmatpush.bf16.msrb.mxu3 %v1709_v25  ;;  %v900_v25 = vperm.slane %v102_v20, 5 }
 0x299   :  { %1262 = vmatpush.bf16.msrb.mxu3 %v1681_v34 }
 0x2f3   :  { %v847_v0 = vpop.f32.mrf.mxu1 }
 0x2f4   :  { %v848_v6 = vadd.f32 %v847_v0, %v828_v47  ;;  %v1825_v47 = vor.u32 %v1968_v44, %v1824_v43  ;;  %v1953_v0 = vld [vmem:[#allocation8 + $0x108] sm:$0xf0]  ;;  %v1653_v43 = vor.u32 %v1922_v38, %v1650_v39  ;;  %v1657_v44 = vor.u32 %v1926_v41, %v1656_v40 }
 0x2f5   :  { %v1761_v3 = vor.u32 %v1953_v0, %v1760_v62 }
 0x2f6   :  { %1992 = vtanh.f32 %v848_v6  ;;  %1270 = vmatpush.bf16.msrb.mxu0 %v1825_v47  ;;  %v1954_v6 = vld [vmem:[#allocation8 + $0x110] sm:$0xf0]  ;;  %1263 = vmatpush.bf16.msrb.mxu3 %v1653_v43 }
 0x2f7   :  { %v1769_v7 = vor.u32 %v1954_v6, %v1768_v5  ;;  %1246 = vmatpush.bf16.msra.mxu2 %v1761_v3 }
 0x2fa   :  { %1271 = vmatpush.bf16.msrb.mxu0 %v1797_v59 }
 0x2fb   :  { %v849_v31 = vpop.f32.mrf.mxu1  ;;  %1247 = vmatpush.bf16.msra.mxu2 %v1733_v12 }
 0x2fc   :  { %v1993_v33 = vpop.eup %1992  ;;  %v1684_v31 = vld [vmem:[#allocation8 + $0x50] sm:$0xf] }
 0x2fd   :  { %v852_v36 = vpack.c.bf16 %v1993_v33, %v1993_v33  ;;  %v1677_v33 = vor.u32 %v1932_v28, %v1676_v27  ;;  %v1685_v35 = vor.u32 %v1933_v32, %v1684_v31 }
 0x2fe   :  { %1272 = vmatpush.bf16.msrb.mxu0 %v1769_v7 }
 0x2ff   :  { %1629 = vmatmul.msk.bf16.vlgmr.msrb.gmra.mxu1 %vm797_vm1, %v852_v36  ;;  %1248 = vmatpush.bf16.msra.mxu2 %v1705_v21  ;;  %v1648_v36 = vld [vmem:[#allocation8 + $0x10] sm:$0xf] }
 0x300   :  { %v1649_v42 = vor.u32 %v1925_v37, %v1648_v36  ;;  %v103_v21 = vld [vmem:[%s2371_s8 + $0x28] sm:$0xff]  ;;  %s2187_s8 = smov [#allocation10]  }
 0x301   :  { %s1332_s25 = sshll.u32 %s2187_s8, 4  ;;  %s1333_s25 = int_to_ptr.vmem [resolvable:$true] %s1332_s25 }
 0x302   :  { %1273 = vmatpush.bf16.msrb.mxu0 %v1741_v17 }
 0x303   :  { %1249 = vmatpush.bf16.msra.mxu2 %v1677_v33 }
 0x306   :  { %1274 = vmatpush.bf16.msrb.mxu0 %v1713_v26  ;;  %v901_v26 = vperm.slane %v103_v21, 5 }
 0x307   :  { %1250 = vmatpush.bf16.msra.mxu2 %v1649_v42 }
 0x30a   :  { %1275 = vmatpush.bf16.msrb.mxu0 %v1685_v35 }
 0x30e   :  { %1276 = vmatpush.bf16.msrb.mxu0 %v1657_v44 }
 0x37c   :  { %v890_v46 = vpop.f32.mrf.mxu1 }
 0x37d   :  { %v891_v47 = vadd.f32 %v890_v46, %v853_v45 }
 0x37f   :  { %v894_v48 = vmax.f32 %v891_v47, 0.0 }
 0x381   :  { %v895_v49 = vpack.c.bf16 %v894_v48, %v894_v48 }
 0x383   :  { %1199 = vmatmul.bf16.vlgmr.msrb.gmra.mxu2 %v895_v49  ;;  %1212 = vmatmul.bf16.vlgmr.msra.gmra.mxu3 %v895_v49 }
 0x384   :  { %1225 = vmatmul.bf16.vlgmr.msra.gmra.mxu0 %v895_v49  ;;  %1238 = vmatmul.bf16.vlgmr.msra.gmra.mxu1 %v895_v49  ;;  %v892_v50 = vpop.f32.mrf.mxu1 }
 0x393   :  { %1251 = vmatmul.bf16.vlgmr.msra.gmra.mxu2 %v895_v49  ;;  %1264 = vmatmul.bf16.vlgmr.msrb.gmra.mxu3 %v895_v49 }
 0x394   :  { %1277 = vmatmul.bf16.vlgmr.msrb.gmra.mxu0 %v895_v49 }
 0x401   :  { %v1226_v56 = vpop.f32.mrf.mxu0  ;;  %v1239_v57 = vpop.f32.mrf.mxu1 }
 0x402   :  { %v1227_v58 = vadd.f32 %v1226_v56, %v898_v53  ;;  %v1240_v59 = vadd.f32 %v1239_v57, %v899_v54 }
 0x404   :  { %v1284_v62 = vsub.f32 0.0, %v1227_v58  ;;  %v1285_v63 = vsub.f32 0.0, %v1240_v59 }
 0x406   :  { %v1293_v0 = vmul.f32 1.442695, %v1284_v62  ;;  %v1295_v1 = vmul.f32 1.442695, %v1285_v63  ;;  %v1200_v2 = vpop.f32.mrf.mxu2  ;;  %v1213_v3 = vpop.f32.mrf.mxu3 }
 0x407   :  { %v1201_v4 = vadd.f32 %v1200_v2, %v896_v60  ;;  %v1214_v5 = vadd.f32 %v1213_v3, %v897_v61 }
 0x408   :  { %1994 = vpow2.f32 %v1293_v0 }
 0x409   :  { %1996 = vpow2.f32 %v1295_v1  ;;  %v1282_v6 = vsub.f32 0.0, %v1201_v4  ;;  %v1283_v7 = vsub.f32 0.0, %v1214_v5  ;;  %v1228_v8 = vpop.f32.mrf.mxu0  ;;  %v1241_v9 = vpop.f32.mrf.mxu1 }
 0x40b   :  { %v1289_v10 = vmul.f32 1.442695, %v1282_v6  ;;  %v1291_v12 = vmul.f32 1.442695, %v1283_v7 }
 0x40d   :  { %1998 = vpow2.f32 %v1289_v10 }
 0x40e   :  { %v1995_v13 = vpop.eup %1994  ;;  %2000 = vpow2.f32 %v1291_v12  ;;  %v1202_v14 = vpop.f32.mrf.mxu2 }
 0x40f   :  { %v1215_v15 = vpop.f32.mrf.mxu3  ;;  %v1997_v17 = vpop.eup %1996  ;;  %v1305_v18 = vadd.f32 1.0, %v1995_v13 }
 0x410   :  { %v1306_v19 = vadd.f32 1.0, %v1997_v17 }
 0x411   :  { %2002 = vrcp.f32 %v1305_v18  ;;  %v1278_v22 = vpop.f32.mrf.mxu0 }
 0x412   :  { %2004 = vrcp.f32 %v1306_v19  ;;  %v1279_v23 = vadd.f32 %v1278_v22, %v902_v16 }
 0x413   :  { %v1999_v24 = vpop.eup %1998 }
 0x414   :  { %v2001_v27 = vpop.eup %2000  ;;  %v1303_v28 = vadd.f32 1.0, %v1999_v24  ;;  %v1288_v29 = vsub.f32 0.0, %v1279_v23 }
 0x415   :  { %v1304_v30 = vadd.f32 1.0, %v2001_v27 }
 0x416   :  { %2006 = vrcp.f32 %v1303_v28  ;;  %v1301_v31 = vmul.f32 1.442695, %v1288_v29  ;;  %v1252_v32 = vpop.f32.mrf.mxu2 }
 0x417   :  { %v1265_v33 = vpop.f32.mrf.mxu3  ;;  %v2003_v34 = vpop.eup %2002  ;;  %2008 = vrcp.f32 %v1304_v30  ;;  %v1253_v35 = vadd.f32 %v1252_v32, %v900_v25 }
 0x418   :  { %v1266_v36 = vadd.f32 %v1265_v33, %v901_v26  ;;  %v2005_v37 = vpop.eup %2004  ;;  %2010 = vpow2.f32 %v1301_v31 }
 0x419   :  { %v1318_v38 = vpack.c.bf16 %v2005_v37, %v2003_v34  ;;  %v1286_v39 = vsub.f32 0.0, %v1253_v35  ;;  %v1280_v41 = vpop.f32.mrf.mxu0 }
 0x41a   :  { %v1287_v40 = vsub.f32 0.0, %v1266_v36 }
 0x41b   :  { %1322 = vst [vmem:[#allocation10 + $0x8] sm:$0xff] %v1318_v38  ;;  %v1297_v42 = vmul.f32 1.442695, %v1286_v39 }
 0x41c   :  { %v1299_v43 = vmul.f32 1.442695, %v1287_v40  ;;  %v2007_v44 = vpop.eup %2006 }
 0x41d   :  { %v2009_v45 = vpop.eup %2008  ;;  %2012 = vpow2.f32 %v1297_v42 }
 0x41e   :  { %v2011_v46 = vpop.eup %2010  ;;  %v1317_v47 = vpack.c.bf16 %v2009_v45, %v2007_v44  ;;  %2014 = vpow2.f32 %v1299_v43  ;;  %v1254_v48 = vpop.f32.mrf.mxu2 }
 0x41f   :  { %v1267_v49 = vpop.f32.mrf.mxu3  ;;  %v1309_v50 = vadd.f32 1.0, %v2011_v46 }
 0x420   :  { %1321 = vst [vmem:[#allocation10] sm:$0xff] %v1317_v47 }
 0x421   :  { %2016 = vrcp.f32 %v1309_v50 }
 0x423   :  { %v2013_v51 = vpop.eup %2012 }
 0x424   :  { %v2015_v52 = vpop.eup %2014  ;;  %v1307_v53 = vadd.f32 1.0, %v2013_v51 }
 0x425   :  { %v1308_v54 = vadd.f32 1.0, %v2015_v52 }
 0x426   :  { %2018 = vrcp.f32 %v1307_v53 }
 0x427   :  { %v2017_v55 = vpop.eup %2016  ;;  %2020 = vrcp.f32 %v1308_v54 }
 0x428   :  { %v1320_v56 = vpack.c.bf16 %v2017_v55, %v2017_v55 }
 0x42a   :  { %1324 = vst [vmem:[#allocation10 + $0x18] sm:$0xf] %v1320_v56 }
 0x42c   :  { %v2019_v57 = vpop.eup %2018 }
 0x42d   :  { %v2021_v58 = vpop.eup %2020 }
 0x42e   :  { %v1319_v59 = vpack.c.bf16 %v2021_v58, %v2019_v57 }
 0x430   :  { %1323 = vst [vmem:[#allocation10 + $0x10] sm:$0xff] %v1319_v59 }
 0x431   :  { %1337 = dma.vmem_to_hbm [thread:$0]  %s1333_s25, 448, %s1335_s4, [#allocation4]  }
 0x432   :  { %2172 = dma.done.wait [#allocation4], 448  }
 0x433   :  { %2173 = vsyncadd [#allocation4], 4294966848 }
 0x434   :  { %2174 = dma.done.wait [#allocation12], 128  }
 0x435   :  { %2175 = vsyncadd [#allocation12], 4294967168 }
 0x436   :  { %1357 = vsyncpa [#allocation3], 1 }
 0x437   :  { %1358 = vsyncpa [#allocation6], 1 }
 0x438   :  { %1359 = vsyncpa [#allocation9], 1 }
 0x439   :  { %1360 = vsyncpa [#allocation4], 1 }
 0x43a   :  { %1361 = vsyncpa [#allocation12], 1 }

</bundles_post_ra>
